<compile_context>
chip_gen: v7x
topology: tpu7x:2x2x1
jax: 0.10.0
libtpu: 0.0.40
codegen_flags: <defaults>
</compile_context>

<pallas_src>
import math

import jax
import jax.numpy as jnp
import numpy as np
from jax.experimental import pallas as pl
from jax.experimental.pallas import tpu as pltpu


def _round_up(x, m):
    return -(-x // m) * m


# ---------------------------------------------------------------------------
# Kernels
# ---------------------------------------------------------------------------
def _time_embedding_onehot_kernel(t_ref, a_ref, w2_ref, b2_ref, o_ref):
    """Small-T path: in-kernel gather of the fused layer-1 table via one-hot MXU matmul."""
    tb = t_ref.shape[0]
    T = a_ref.shape[0]

    pos = jax.lax.broadcasted_iota(jnp.int32, (tb, T), 1)            # (TB, T)
    onehot = (pos == t_ref[...]).astype(jnp.float32)                 # (TB, T)
    # h = A[t] = emb[t] @ W1 + b1   (fused table gathered on the MXU, K = T)
    h = jnp.dot(onehot, a_ref[...], preferred_element_type=jnp.float32)   # (TB, out_dim)

    h = h * jax.nn.sigmoid(h)                                        # Swish (EUP/VPU, f32)

    y = jnp.dot(h, w2_ref[...], preferred_element_type=jnp.float32) + b2_ref[...]
    o_ref[...] = y.astype(o_ref.dtype)                               # lane-dense (TB, out_dim)


def _time_embedding_gathered_kernel(h_ref, w2_ref, b2_ref, o_ref):
    """Large-T path: layer-1 pre-activations were gathered in the wrapper."""
    h = h_ref[...]                                                   # (TB, out_dim) = A[t]
    h = h * jax.nn.sigmoid(h)                                        # Swish
    y = jnp.dot(h, w2_ref[...], preferred_element_type=jnp.float32) + b2_ref[...]
    o_ref[...] = y.astype(o_ref.dtype)


# ---------------------------------------------------------------------------
# Parameter construction (mirrors the PyTorch module)
# ---------------------------------------------------------------------------
def make_sinusoidal_table(T, in_dim):
    freq = jnp.arange(0, in_dim, 2, dtype=jnp.float32)
    freq = jnp.exp(-freq * math.log(10000.0) / in_dim)
    pos = jnp.arange(T, dtype=jnp.float32)
    emb = pos[:, None] * freq[None, :]                               # (T, in_dim//2)
    emb = jnp.stack([jnp.sin(emb), jnp.cos(emb)], axis=-1)           # (T, in_dim//2, 2)
    return emb.reshape(T, in_dim)                                    # interleaved sin/cos


def init_params(key, in_dim, out_dim):
    # Xavier-uniform weights, zero bias (as in TimeEmbedding.initialize()); stored (in, out).
    k1, k2 = jax.random.split(key)
    bound1 = math.sqrt(6.0 / (in_dim + out_dim))
    bound2 = math.sqrt(6.0 / (out_dim + out_dim))
    w1 = jax.random.uniform(k1, (in_dim, out_dim), jnp.float32, -bound1, bound1)
    w2 = jax.random.uniform(k2, (out_dim, out_dim), jnp.float32, -bound2, bound2)
    b1 = jnp.zeros((1, out_dim), jnp.float32)
    b2 = jnp.zeros((1, out_dim), jnp.float32)
    return w1, b1, w2, b2


# ---------------------------------------------------------------------------
# Wrapper
# ---------------------------------------------------------------------------
def time_embedding(t, emb_table, w1, b1, w2, b2, *, max_tile=256, onehot_max_t=128):
    B = t.shape[0]
    T, in_dim = emb_table.shape
    out_dim = w1.shape[1]

    # Layer-1 fusion (exact for a one-hot gather): A[k] = emb_table[k] @ W1 + b1.
    a_table = (emb_table @ w1 + b1).astype(jnp.float32)              # (T, out_dim)

    # TODO(synk): nn.Embedding raises on out-of-range indices; we clamp instead.
    t32 = jnp.clip(t.astype(jnp.int32), 0, T - 1)

    # Evenly-sized batch tiles: multiple of 8 rows, at most max_tile rows per tile.
    n_tiles = max(1, -(-_round_up(B, 8) // max_tile))
    if B >= 512 and n_tiles % 2:
        n_tiles += 1          # v7x: even number of "parallel" tiles keeps both TCs busy
    TB = _round_up(-(-B // n_tiles), 8)
    Bp = n_tiles * TB
    grid = (n_tiles,)

    # Resident operands (constant index_maps -> fetched once). Single-buffer them when
    # large enough that default double-buffering would meaningfully inflate VMEM use.
    use_onehot = T <= onehot_max_t
    resident_bytes = 4 * (w2.size + b2.size) + (4 * a_table.size if use_onehot else 0)
    n_resident_bufs = 1 if resident_bytes > (2 << 20) else 2
    resident_kw = dict(pipeline_mode=pl.Buffered(1)) if n_resident_bufs == 1 else {}

    # Explicit VMEM budget: resident operands + double-buffered streaming tiles + slack.
    stream_bytes = 4 * TB * (out_dim + (1 if use_onehot else out_dim))
    vmem_needed = n_resident_bufs * resident_bytes + 2 * stream_bytes + (4 << 20)
    vmem_limit = int(min(48 << 20, max(32 << 20, vmem_needed)))

    compiler_params = pltpu.CompilerParams(
        dimension_semantics=("parallel",),       # batch tiles shard across v7x's 2 TCs
        vmem_limit_bytes=vmem_limit,
    )

    w2_spec = pl.BlockSpec((out_dim, out_dim), lambda i: (0, 0), **resident_kw)
    b2_spec = pl.BlockSpec((1, out_dim), lambda i: (0, 0), **resident_kw)
    out_spec = pl.BlockSpec((TB, out_dim), lambda i: (i, 0))
    out_shape = jax.ShapeDtypeStruct((Bp, out_dim), jnp.float32)

    if use_onehot:
        # Small T: keep the fused (T, out_dim) table resident and gather in-kernel.
        t_in = t32 if Bp == B else jnp.pad(t32, (0, Bp - B))
        t_in = t_in.reshape(Bp, 1)
        out = pl.pallas_call(
            _time_embedding_onehot_kernel,
            out_shape=out_shape,
            grid_spec=pltpu.PrefetchScalarGridSpec(
                num_scalar_prefetch=0,
                grid=grid,
                in_specs=[
                    pl.BlockSpec((TB, 1), lambda i: (i, 0)),                       # t tile
                    pl.BlockSpec((T, out_dim), lambda i: (0, 0), **resident_kw),   # fused table
                    w2_spec,
                    b2_spec,
                ],
                out_specs=out_spec,
            ),
            compiler_params=compiler_params,
        )(t_in, a_table, w2, b2)
    else:
        # Large T (DDPM T ~ 1000): avoid the O(TB*T) one-hot — gather the fused rows with
        # an XLA gather in the wrapper and stream the (B, out_dim) pre-activations.
        h0 = jnp.take(a_table, t32, axis=0)                                        # (B, out_dim)
        if Bp != B:
            h0 = jnp.pad(h0, ((0, Bp - B), (0, 0)))
        out = pl.pallas_call(
            _time_embedding_gathered_kernel,
            out_shape=out_shape,
            grid_spec=pltpu.PrefetchScalarGridSpec(
                num_scalar_prefetch=0,
                grid=grid,
                in_specs=[
                    pl.BlockSpec((TB, out_dim), lambda i: (i, 0)),                 # A[t] tile
                    w2_spec,
                    b2_spec,
                ],
                out_specs=out_spec,
            ),
            compiler_params=compiler_params,
        )(h0, w2, b2)

    return out if Bp == B else out[:B]


# ---------------------------------------------------------------------------
# Pure-JAX reference (mirrors the PyTorch forward)
# ---------------------------------------------------------------------------
def time_embedding_ref(t, emb_table, w1, b1, w2, b2):
    x = emb_table[t]                       # nn.Embedding lookup
    h = x @ w1 + b1                        # nn.Linear
    h = h * jax.nn.sigmoid(h)              # Swish
    return h @ w2 + b2                     # nn.Linear


if __name__ == "__main__":
    key = jax.random.PRNGKey(0)
    k_param, k_t1, k_t2, k_t3 = jax.random.split(key, 4)

    # Primary small config (one-hot path, single tile, no padding).
    T, in_dim, out_dim, B = 16, 32, 128, 8
    emb_table = make_sinusoidal_table(T, in_dim)
    w1, b1, w2, b2 = init_params(k_param, in_dim, out_dim)
    t = jax.random.randint(k_t1, (B,), 0, T, dtype=jnp.int32)

    out = time_embedding(t, emb_table, w1, b1, w2, b2)
    out = jax.block_until_ready(out)
    ref = time_embedding_ref(t, emb_table, w1, b1, w2, b2)
    np.testing.assert_allclose(np.asarray(out), np.asarray(ref), rtol=1e-5, atol=1e-5)

    # Coverage: multi-tile batch with even split + padding (one-hot path, grid=(2,)).
    t_big = jax.random.randint(k_t2, (260,), 0, T, dtype=jnp.int32)
    out_big = jax.block_until_ready(time_embedding(t_big, emb_table, w1, b1, w2, b2))
    ref_big = time_embedding_ref(t_big, emb_table, w1, b1, w2, b2)
    np.testing.assert_allclose(np.asarray(out_big), np.asarray(ref_big), rtol=1e-5, atol=1e-5)

    # Coverage: large-T path (wrapper-side gather instead of in-kernel one-hot).
    T2 = 300
    emb_table2 = make_sinusoidal_table(T2, in_dim)
    t2 = jax.random.randint(k_t3, (20,), 0, T2, dtype=jnp.int32)
    out2 = jax.block_until_ready(time_embedding(t2, emb_table2, w1, b1, w2, b2))
    ref2 = time_embedding_ref(t2, emb_table2, w1, b1, w2, b2)
    np.testing.assert_allclose(np.asarray(out2), np.asarray(ref2), rtol=1e-5, atol=1e-5)

    print("KERNEL_OK")
</pallas_src>

<mosaic_0001>
module attributes {stable_mosaic.version = 11 : i64} {
  func.func @_time_embedding_onehot_kernel(%arg0: i32, %arg1: memref<8x1xi32, #tpu.memory_space<vmem>>, %arg2: memref<16x128xf32, #tpu.memory_space<vmem>>, %arg3: memref<128x128xf32, #tpu.memory_space<vmem>>, %arg4: memref<1x128xf32, #tpu.memory_space<vmem>>, %arg5: memref<8x128xf32, #tpu.memory_space<vmem>>) attributes {dimension_semantics = [#tpu.dimension_semantics<parallel>], iteration_bounds = array<i64: 1>, scalar_prefetch = 0 : i64, scratch_operands = 0 : i64, tpu.core_type = #tpu.core_type<tc>, window_params = [{transform_indices = @transform_0, window_bounds = array<i64: 8, 1>}, {pipeline_mode = #tpu.pipeline_mode<synchronous>, transform_indices = @transform_1, window_bounds = array<i64: 16, 128>}, {pipeline_mode = #tpu.pipeline_mode<synchronous>, transform_indices = @transform_2, window_bounds = array<i64: 128, 128>}, {pipeline_mode = #tpu.pipeline_mode<synchronous>, transform_indices = @transform_3, window_bounds = array<i64: 1, 128>}, {transform_indices = @transform_4, window_bounds = array<i64: 8, 128>}]} {
    %0 = tpu.iota {dimensions = array<i32: 1>} : vector<8x16xi32>
    %c0 = arith.constant 0 : index
    %c0_0 = arith.constant 0 : index
    %1 = vector.load %arg1[%c0, %c0_0] : memref<8x1xi32, #tpu.memory_space<vmem>>, vector<8x1xi32>
    %2 = vector.broadcast %1 : vector<8x1xi32> to vector<8x16xi32>
    %3 = arith.cmpi eq, %0, %2 : vector<8x16xi32>
    %4 = arith.extui %3 : vector<8x16xi1> to vector<8x16xi32>
    %5 = arith.sitofp %4 : vector<8x16xi32> to vector<8x16xf32>
    %c0_1 = arith.constant 0 : index
    %c0_2 = arith.constant 0 : index
    %6 = vector.load %arg2[%c0_1, %c0_2] : memref<16x128xf32, #tpu.memory_space<vmem>>, vector<16x128xf32>
    %cst = arith.constant dense<0.000000e+00> : vector<8x128xf32>
    %7 = tpu.matmul %5, %6, %cst {dimension_numbers = #tpu.dot_dimension_numbers<[1], [0], [0], [1], [0, 0, 1, 1], [], []>} : vector<8x16xf32>, vector<16x128xf32>, vector<8x128xf32> -> vector<8x128xf32>
    %8 = arith.negf %7 : vector<8x128xf32>
    %9 = math.exp %8 : vector<8x128xf32>
    %cst_3 = arith.constant 1.000000e+00 : f32
    %10 = vector.broadcast %cst_3 : f32 to vector<8x128xf32>
    %11 = arith.addf %10, %9 : vector<8x128xf32>
    %12 = arith.divf %10, %11 : vector<8x128xf32>
    %13 = arith.mulf %7, %12 : vector<8x128xf32>
    %c0_4 = arith.constant 0 : index
    %c0_5 = arith.constant 0 : index
    %14 = vector.load %arg3[%c0_4, %c0_5] : memref<128x128xf32, #tpu.memory_space<vmem>>, vector<128x128xf32>
    %cst_6 = arith.constant dense<0.000000e+00> : vector<8x128xf32>
    %15 = tpu.matmul %13, %14, %cst_6 {dimension_numbers = #tpu.dot_dimension_numbers<[1], [0], [0], [1], [0, 0, 1, 1], [], []>} : vector<8x128xf32>, vector<128x128xf32>, vector<8x128xf32> -> vector<8x128xf32>
    %c0_7 = arith.constant 0 : index
    %c0_8 = arith.constant 0 : index
    %16 = vector.load %arg4[%c0_7, %c0_8] : memref<1x128xf32, #tpu.memory_space<vmem>>, vector<1x128xf32>
    %17 = vector.broadcast %16 : vector<1x128xf32> to vector<8x128xf32>
    %18 = arith.addf %15, %17 : vector<8x128xf32>
    %c0_9 = arith.constant 0 : index
    %c0_10 = arith.constant 0 : index
    %19 = vector.load %arg5[%c0_9, %c0_10] : memref<8x128xf32, #tpu.memory_space<vmem>>, vector<8x128xf32>
    tpu.vector_store %arg5[%c0_9, %c0_10], %18 {strides = array<i32>} : memref<8x128xf32, #tpu.memory_space<vmem>>, vector<8x128xf32>,
    return
  }
  func.func @transform_0(%arg0: i32) -> (i32, i32) {
    %c0_i32 = arith.constant 0 : i32
    %c0_i32_0 = arith.constant 0 : i32
    return %arg0, %c0_i32 : i32, i32
  }
  func.func @transform_1(%arg0: i32) -> (i32, i32) {
    %c0_i32 = arith.constant 0 : i32
    %c0_i32_0 = arith.constant 0 : i32
    %c0_i32_1 = arith.constant 0 : i32
    return %c0_i32, %c0_i32_0 : i32, i32
  }
  func.func @transform_2(%arg0: i32) -> (i32, i32) {
    %c0_i32 = arith.constant 0 : i32
    %c0_i32_0 = arith.constant 0 : i32
    %c0_i32_1 = arith.constant 0 : i32
    return %c0_i32, %c0_i32_0 : i32, i32
  }
  func.func @transform_3(%arg0: i32) -> (i32, i32) {
    %c0_i32 = arith.constant 0 : i32
    %c0_i32_0 = arith.constant 0 : i32
    %c0_i32_1 = arith.constant 0 : i32
    return %c0_i32, %c0_i32_0 : i32, i32
  }
  func.func @transform_4(%arg0: i32) -> (i32, i32) {
    %c0_i32 = arith.constant 0 : i32
    %c0_i32_0 = arith.constant 0 : i32
    return %arg0, %c0_i32 : i32, i32
  }
}

</mosaic_0001>

<bundles_post_ra>
// kernel: tpu_custom_call.1
= control target key start
LH: loop header
LB: loop body
LE: loop exit
PB: predicated region body
PF: predicated region fallthrough
CT: control target
= control target key end

     0   :  { %9 = vsyncpa [#allocation3], 0  ;;  %s503_s0 = inlined_call_operand.vmem [shape: s32[8,1], index: 0, kind: input, shape index: {}]   ;;  %s504_s1 = inlined_call_operand.hbm [shape: f32[16,128], index: 1, kind: input, shape index: {}]   ;;  %s505_s2 = inlined_call_operand.hbm [shape: f32[128,128], index: 2, kind: input, shape index: {}]   ;;  %s506_s3 = inlined_call_operand.vmem [shape: f32[1,128], index: 3, kind: input, shape index: {}]   ;;  %s507_s4 = inlined_call_operand.hbm [shape: f32[8,128], index: 4, kind: output, shape index: {}]  }
   0x1   :  { %10 = vsyncpa [#allocation6], 0 }
   0x2   :  { %11 = vsyncpa [#allocation4], 0  ;;  %s427_s15 = smov [#allocation2]   ;;  %s355_s19 = scalar_lea.hbm %s504_s1, 256 }
   0x3   :  { %s19_s16 = sshll.u32 %s427_s15, 4  ;;  %p356_p0 = scmp.ne.s32.totalorder %s504_s1, %s355_s19  ;;  %s20_s16 = int_to_ptr.vmem [resolvable:$true] %s19_s16 }
   0x4   :  { %p359_p1 = scmp.lt.u32.totalorder %s355_s19, %s504_s1 }
   0x6   :  { %p361_p2 = pnand %p359_p1, %p356_p0 }
   0x8   :  { %364 = shalt.err (!%p361_p2)
}
   0x9   :  { %s365_s24 = scalar_lea.vmem %s20_s16, 256  ;;  %p370_p4 = scmp.lt.s32.totalorder %s20_s16, %s20_s16 }
   0xa   :  { %p366_p3 = scmp.ne.s32.totalorder %s20_s16, %s365_s24  ;;  %p371_p5 = scmp.lt.s32.totalorder %s365_s24, %s365_s24 }
   0xc   :  { %p372_p6 = por %p371_p5, %p370_p4 }
   0xe   :  { %p373_p7 = pnand %p372_p6, %p366_p3 }
  0x10   :  { %376 = shalt.err (!%p373_p7)
}
  0x11   :  { %s428_s25 = smov 128   ;;  %s429_s26 = smov 8  }
  0x12   :  { %25 = dma.hbm_to_vmem [thread:$0]  %s504_s1, 256, %s20_s16, [#allocation3], %s428_s25, %s428_s25, %s429_s26  }
  0x13   :  { %s430_s29 = smov [#allocation5]   ;;  %s377_s7 = scalar_lea.hbm %s505_s2, 2048 }
  0x14   :  { %s31_s30 = sshll.u32 %s430_s29, 4  ;;  %p378_p8 = scmp.ne.s32.totalorder %s505_s2, %s377_s7  ;;  %s32_s30 = int_to_ptr.vmem [resolvable:$true] %s31_s30 }
  0x15   :  { %p381_p9 = scmp.lt.u32.totalorder %s377_s7, %s505_s2 }
  0x17   :  { %p383_p10 = pnand %p381_p9, %p378_p8 }
  0x19   :  { %386 = shalt.err (!%p383_p10)
}
  0x1a   :  { %s387_s12 = scalar_lea.vmem %s32_s30, 2048  ;;  %p392_p12 = scmp.lt.s32.totalorder %s32_s30, %s32_s30 }
  0x1b   :  { %p388_p11 = scmp.ne.s32.totalorder %s32_s30, %s387_s12  ;;  %p393_p13 = scmp.lt.s32.totalorder %s387_s12, %s387_s12 }
  0x1d   :  { %p394_p0 = por %p393_p13, %p392_p12 }
  0x1f   :  { %p395_p1 = pnand %p394_p0, %p388_p11 }
  0x21   :  { %398 = shalt.err (!%p395_p1)
}
  0x22   :  { %37 = dma.hbm_to_vmem [thread:$0]  %s505_s2, 2048, %s32_s30, [#allocation6], %s428_s25, %s428_s25, %s429_s26  }
  0x23   :  { %421 = dma.done.wait [#allocation3], 256  }
  0x24   :  { %422 = vsyncadd [#allocation3], 4294967040 }
  0x25   :  { %423 = dma.done.wait [#allocation6], 2048  }
  0x26   :  { %424 = vsyncadd [#allocation6], 4294965248  ;;  %v431_v0 = vmov 0   ;;  %v432_v1 = vmov 0.0|0.0   ;;  %v48_v2 = vld [vmem:[%s503_s0] sm:$0xff]  ;;  %v55_v3 = vld [vmem:[#allocation2] sm:$0xff]  ;;  %v46_v10 = vlaneseq }
  0x27   :  { %350 = vset.pattern.permute.xlu0 %v431_v0  ;;  %314 = vmatprep.subr.bf16.mxu0 %v432_v1  ;;  %v56_v4 = vld [vmem:[#allocation2 + $0x8] sm:$0xff]  ;;  %vm433_vm0 = vmmov 0   ;;  %v434_v6 = vmov 0.0   ;;  %v138_v7 = vld [vmem:[#allocation5] sm:$0xff]  ;;  %v139_v8 = vld [vmem:[#allocation5 + $0x8] sm:$0xff]  ;;  %vm57_vm1 = vcmask 130048  }
  0x28   :  { %317 = vmatprep.subr.bf16.mxu1 %v432_v1  ;;  %50 = vperm.xlu0 %350, %v48_v2   ;;  %v315_v5 = vpack.c.bf16 %v56_v4, %v55_v3  ;;  %v318_v9 = vpack.c.bf16 %v139_v8, %v138_v7  ;;  %v47_v11 = vand.u32 127, %v46_v10  ;;  %v140_v14 = vld [vmem:[#allocation5 + $0x10] sm:$0xff]  ;;  %v141_v15 = vld [vmem:[#allocation5 + $0x18] sm:$0xff]  ;;  %v142_v17 = vld [vmem:[#allocation5 + $0x20] sm:$0xff]  ;;  %s435_s16 = smov [#allocation7]  }
  0x29   :  { %276 = vmatprep.mubr.msk.f32.mxu0 %vm433_vm0, %v434_v6  ;;  %311 = vmatprep.mubr.msk.f32.mxu1 %vm433_vm0, %v434_v6  ;;  %v321_v16 = vpack.c.bf16 %v141_v15, %v140_v14  ;;  %v143_v18 = vld [vmem:[#allocation5 + $0x28] sm:$0xff]  ;;  %v144_v20 = vld [vmem:[#allocation5 + $0x30] sm:$0xff]  ;;  %v145_v21 = vld [vmem:[#allocation5 + $0x38] sm:$0xff]  ;;  %s238_s17 = sshll.u32 %s435_s16, 4  ;;  %s239_s17 = int_to_ptr.vmem [resolvable:$true] %s238_s17 }
  0x2a   :  { %316 = vmatpush3.bf16.msra.mxu0 %v315_v5  ;;  %319 = vmatpush3.bf16.msra.mxu1 %v318_v9  ;;  %v324_v19 = vpack.c.bf16 %v143_v18, %v142_v17  ;;  %v327_v22 = vpack.c.bf16 %v145_v21, %v144_v20  ;;  %v146_v23 = vld [vmem:[#allocation5 + $0x40] sm:$0xff]  ;;  %v147_v24 = vld [vmem:[#allocation5 + $0x48] sm:$0xff]  ;;  %v148_v26 = vld [vmem:[#allocation5 + $0x50] sm:$0xff]  ;;  %s399_s18 = scalar_lea.vmem %s239_s17, 128  ;;  %p404_p3 = scmp.lt.s32.totalorder %s239_s17, %s239_s17 }
  0x2b   :  { %320 = vmatprep.subr.bf16.mxu1 %v432_v1  ;;  %v330_v25 = vpack.c.bf16 %v147_v24, %v146_v23  ;;  %v149_v27 = vld [vmem:[#allocation5 + $0x58] sm:$0xff]  ;;  %v150_v29 = vld [vmem:[#allocation5 + $0x60] sm:$0xff]  ;;  %v151_v30 = vld [vmem:[#allocation5 + $0x68] sm:$0xff]  ;;  %p400_p2 = scmp.ne.s32.totalorder %s239_s17, %s399_s18  ;;  %p405_p4 = scmp.lt.s32.totalorder %s399_s18, %s399_s18 }
  0x2c   :  { %v333_v28 = vpack.c.bf16 %v149_v27, %v148_v26  ;;  %v336_v31 = vpack.c.bf16 %v151_v30, %v150_v29  ;;  %v152_v32 = vld [vmem:[#allocation5 + $0x70] sm:$0xff]  ;;  %v153_v33 = vld [vmem:[#allocation5 + $0x78] sm:$0xff]  ;;  %v251_v42 = vld [vmem:[%s506_s3] ss:$0 sm:$0xff] }
  0x2d   :  { %v339_v34 = vpack.c.bf16 %v153_v33, %v152_v32  ;;  %p406_p5 = por %p405_p4, %p404_p3 }
  0x2e   :  { %322 = vmatpush3.bf16.msra.mxu1 %v321_v16 }
  0x2f   :  { %323 = vmatprep.subr.bf16.mxu1 %v432_v1  ;;  %p407_p6 = pnand %p406_p5, %p400_p2 }
  0x32   :  { %325 = vmatpush3.bf16.msra.mxu1 %v324_v19 }
  0x33   :  { %326 = vmatprep.subr.bf16.mxu1 %v432_v1 }
  0x36   :  { %328 = vmatpush3.bf16.msra.mxu1 %v327_v22 }
  0x37   :  { %329 = vmatprep.subr.bf16.mxu1 %v432_v1 }
  0x3a   :  { %331 = vmatpush3.bf16.msra.mxu1 %v330_v25 }
  0x3b   :  { %332 = vmatprep.subr.bf16.mxu1 %v432_v1 }
  0x3e   :  { %334 = vmatpush3.bf16.msra.mxu1 %v333_v28 }
  0x3f   :  { %335 = vmatprep.subr.bf16.mxu1 %v432_v1 }
  0x42   :  { %337 = vmatpush3.bf16.msra.mxu1 %v336_v31 }
  0x43   :  { %338 = vmatprep.subr.bf16.mxu1 %v432_v1 }
  0x46   :  { %340 = vmatpush3.bf16.msra.mxu1 %v339_v34 }
  0xa7   :  { %v51_v12 = vpop.permute.xlu0 %50 }
  0xa8   :  { %vm52_vm2 = vcmp.eq.s32.totalorder %v47_v11, %v51_v12 }
  0xa9   :  { %v248_v13 = vsel %vm52_vm2, 1.0, %v434_v6 }
  0xaa   :  { %277 = vmatmul.mubr.msk.f32.vlgmr.msra.gmra.mrb[0].mxu0 %vm57_vm1, %v248_v13 }
 0x17d   :  { %v127_v35 = vpop.f32.mrb[0].mxu0 }
 0x17e   :  { %v250_v36 = vmul.f32 -1.442695, %v127_v35  ;;  %v278_v37 = vpop.f32.mrb[1].mxu0 }
 0x180   :  { %351 = vpow2.f32 %v250_v36 }
 0x18a   :  { %v352_v38 = vpop.eup %351 }
 0x18b   :  { %v134_v39 = vadd.f32 1.0, %v352_v38 }
 0x18d   :  { %353 = vrcp.f32 %v134_v39 }
 0x197   :  { %v354_v40 = vpop.eup %353 }
 0x198   :  { %v137_v41 = vmul.f32 %v354_v40, %v127_v35 }
 0x19a   :  { %312 = vmatmul.mubr.f32.vlgmr.msra.gmra.mrb[0].mxu1 %v137_v41 }
 0x26d   :  { %v227_v43 = vpop.f32.mrb[0].mxu1 }
 0x26e   :  { %v228_v44 = vadd.f32 %v251_v42, %v227_v43  ;;  %v313_v45 = vpop.f32.mrb[1].mxu1 }
 0x270   :  { %231 = vst [vmem:[#allocation7] sm:$0xff] %v228_v44 }
 0x271   :  { %410 = shalt.err (!%p407_p6)
}
 0x272   :  { %s411_s21 = scalar_lea.hbm %s507_s4, 128 }
 0x273   :  { %p412_p7 = scmp.ne.s32.totalorder %s507_s4, %s411_s21  ;;  %p415_p8 = scmp.lt.u32.totalorder %s411_s21, %s507_s4 }
 0x275   :  { %p417_p9 = pnand %p415_p8, %p412_p7 }
 0x277   :  { %420 = shalt.err (!%p417_p9)
}
 0x278   :  { %241 = dma.vmem_to_hbm [thread:$0]  %s239_s17, 128, %s507_s4, [#allocation4]  }
 0x279   :  { %425 = dma.done.wait [#allocation4], 128  }
 0x27a   :  { %426 = vsyncadd [#allocation4], 4294967168 }
 0x27b   :  { %245 = vsyncpa [#allocation3], 1 }
 0x27c   :  { %246 = vsyncpa [#allocation6], 1 }
 0x27d   :  { %247 = vsyncpa [#allocation4], 1 }

</bundles_post_ra>
